<compile_context>
chip_gen: v7x
topology: tpu7x:2x2x1
jax: 0.10.0
libtpu: 0.0.40
codegen_flags: <defaults>
</compile_context>

<pallas_src>
import math

import jax
import jax.numpy as jnp
from jax.experimental import pallas as pl
from jax.experimental.pallas import tpu as pltpu


def _noise_injection_kernel(img_ref, noise_ref, w_ref, out_ref):
    # img/noise/out: (gtile, SUB, L) VMEM tiles; w: (1, SUB, L) pinned slab.
    # Broadcast is along the leading (non-layout) dim -> pure VPU FMA on full vregs.
    out_ref[...] = (img_ref[...] + w_ref[...] * noise_ref[...]).astype(out_ref.dtype)


def _hw_budget():
    """(target_block_bytes_per_array, vmem_limit_bytes) — generation aware, v7x-safe."""
    try:
        kind = jax.devices()[0].device_kind.lower()
    except Exception:
        kind = ""
    if ("v5" in kind) or ("v6" in kind):
        # 128 MiB VMEM chips: bigger blocks, higher scoped-VMEM cap (3 arrays x 2 bufs
        # x 12 MiB = 72 MiB <= 96 MiB cap, well under 128 MiB physical).
        return 12 << 20, 96 << 20
    # v7x (64 MiB physical VMEM) and unknown chips: 3 x 2 x 8 MiB = 48 MiB <= 56 MiB cap.
    return 8 << 20, 56 << 20


@jax.jit
def noise_injection(image, noise, weight):
    """image, noise: (..., C); weight: (C,). Returns image + weight * noise."""
    assert image.shape == noise.shape, "image and noise must have the same shape"
    C = weight.shape[0]
    assert image.shape[-1] == C, "weight broadcasts against the trailing axis"

    orig_shape = image.shape
    out_dtype = jnp.result_type(image.dtype, noise.dtype, weight.dtype)
    itemsizes = [jnp.dtype(d).itemsize for d in (image.dtype, noise.dtype, out_dtype)]
    total = image.size

    # Lane/sublane-dense layout: L % C == 0 keeps the trailing-axis broadcast exact for
    # every (g, s) row; L % 128 == 0 keeps stores unmasked full-lane.
    L = C * 128 // math.gcd(C, 128)                 # lcm(C, 128)
    SUB = max(8, 32 // min(itemsizes))              # 8 f32 / 16 bf16 / 32 int8 packing
    super_row = SUB * L

    target_block_bytes, vmem_limit = _hw_budget()

    G = pl.cdiv(total, super_row)
    per_g_bytes = super_row * max(itemsizes)
    gtile = max(1, min(target_block_bytes // per_g_bytes, G))
    grid = (pl.cdiv(G, gtile),)                     # partial last block masked by Pallas

    img_flat = image.reshape(-1)
    noise_flat = noise.reshape(-1)
    padded_total = G * super_row
    needs_pad = padded_total != total
    if needs_pad:
        # Rare fallback: tiny tail pad up to SUB*L-1 elements (no full round-up).
        pad = padded_total - total
        img_flat = jnp.pad(img_flat, (0, pad))
        noise_flat = jnp.pad(noise_flat, (0, pad))
    img3 = img_flat.reshape(G, SUB, L)
    noise3 = noise_flat.reshape(G, SUB, L)

    # (1, SUB, L) weight slab (kept in weight's own dtype so bf16 I/O + f32 weight
    # matches PyTorch promotion). Since L % C == 0, every row is weight[l % C].
    w3 = jnp.tile(weight, SUB * (L // C)).reshape(1, SUB, L)

    out3 = pl.pallas_call(
        _noise_injection_kernel,
        out_shape=jax.ShapeDtypeStruct((G, SUB, L), out_dtype),
        grid_spec=pltpu.PrefetchScalarGridSpec(
            num_scalar_prefetch=0,
            grid=grid,
            in_specs=[
                pl.BlockSpec((gtile, SUB, L), lambda i: (i, 0, 0)),   # image tile
                pl.BlockSpec((gtile, SUB, L), lambda i: (i, 0, 0)),   # noise tile
                pl.BlockSpec((1, SUB, L), lambda i: (0, 0, 0)),       # weight (pinned)
            ],
            out_specs=pl.BlockSpec((gtile, SUB, L), lambda i: (i, 0, 0)),
        ),
        compiler_params=pltpu.CompilerParams(
            # v7x note: if profiling shows only one TensorCore active, promote to a
            # leading size-2 grid axis marked pltpu.CORE_PARALLEL (or pl.core_map);
            # "parallel" is the portable default and correct on single-TC v5e/v6e.
            dimension_semantics=("parallel",),
            vmem_limit_bytes=vmem_limit,
        ),
    )(img3, noise3, w3)

    out_flat = out3.reshape(-1)
    if needs_pad:
        out_flat = out_flat[:total]
    return out_flat.reshape(orig_shape)


if __name__ == "__main__":
    key = jax.random.PRNGKey(0)
    k_img, k_noise = jax.random.split(key)

    N, H, W, C = 2, 16, 16, 4          # channel-last (NHWC) layout
    image = jax.random.normal(k_img, (N, H, W, C), dtype=jnp.float32)
    noise = jax.random.normal(k_noise, (N, H, W, C), dtype=jnp.float32)
    # nn.Parameter(torch.zeros(channel)) is all-zeros by default; use a deterministic
    # non-zero init so the multiply-add path is actually exercised.
    weight = jnp.linspace(-0.5, 0.5, C, dtype=jnp.float32)

    out = jax.block_until_ready(noise_injection(image, noise, weight))
    ref = image + weight * noise
    assert out.shape == image.shape and out.dtype == ref.dtype
    assert jnp.allclose(out, ref, atol=1e-6), "mismatch vs reference (aligned path)"

    # Also exercise the (rare) tail-pad fallback path: total not a multiple of SUB*L.
    image2 = jax.random.normal(k_img, (2, 15, 16, C), dtype=jnp.float32)
    noise2 = jax.random.normal(k_noise, (2, 15, 16, C), dtype=jnp.float32)
    out2 = jax.block_until_ready(noise_injection(image2, noise2, weight))
    ref2 = image2 + weight * noise2
    assert jnp.allclose(out2, ref2, atol=1e-6), "mismatch vs reference (padded path)"

    print("KERNEL_OK")
</pallas_src>

<mosaic_0001>
module attributes {stable_mosaic.version = 11 : i64} {
  func.func @_noise_injection_kernel(%arg0: i32, %arg1: memref<2x8x128xf32, #tpu.memory_space<vmem>>, %arg2: memref<2x8x128xf32, #tpu.memory_space<vmem>>, %arg3: memref<1x8x128xf32, #tpu.memory_space<vmem>>, %arg4: memref<2x8x128xf32, #tpu.memory_space<vmem>>) attributes {dimension_semantics = [#tpu.dimension_semantics<parallel>], iteration_bounds = array<i64: 1>, scalar_prefetch = 0 : i64, scratch_operands = 0 : i64, tpu.core_type = #tpu.core_type<tc>, window_params = [{transform_indices = @transform_0, window_bounds = array<i64: 2, 8, 128>}, {transform_indices = @transform_1, window_bounds = array<i64: 2, 8, 128>}, {pipeline_mode = #tpu.pipeline_mode<synchronous>, transform_indices = @transform_2, window_bounds = array<i64: 1, 8, 128>}, {transform_indices = @transform_3, window_bounds = array<i64: 2, 8, 128>}]} {
    %c0 = arith.constant 0 : index
    %c0_0 = arith.constant 0 : index
    %c0_1 = arith.constant 0 : index
    %0 = vector.load %arg1[%c0, %c0_0, %c0_1] : memref<2x8x128xf32, #tpu.memory_space<vmem>>, vector<2x8x128xf32>
    %c0_2 = arith.constant 0 : index
    %c0_3 = arith.constant 0 : index
    %c0_4 = arith.constant 0 : index
    %1 = vector.load %arg3[%c0_2, %c0_3, %c0_4] : memref<1x8x128xf32, #tpu.memory_space<vmem>>, vector<1x8x128xf32>
    %c0_5 = arith.constant 0 : index
    %c0_6 = arith.constant 0 : index
    %c0_7 = arith.constant 0 : index
    %2 = vector.load %arg2[%c0_5, %c0_6, %c0_7] : memref<2x8x128xf32, #tpu.memory_space<vmem>>, vector<2x8x128xf32>
    %3 = vector.broadcast %1 : vector<1x8x128xf32> to vector<2x8x128xf32>
    %4 = arith.mulf %3, %2 : vector<2x8x128xf32>
    %5 = arith.addf %0, %4 : vector<2x8x128xf32>
    %c0_8 = arith.constant 0 : index
    %c0_9 = arith.constant 0 : index
    %c0_10 = arith.constant 0 : index
    %6 = vector.load %arg4[%c0_8, %c0_9, %c0_10] : memref<2x8x128xf32, #tpu.memory_space<vmem>>, vector<2x8x128xf32>
    tpu.vector_store %arg4[%c0_8, %c0_9, %c0_10], %5 {strides = array<i32>} : memref<2x8x128xf32, #tpu.memory_space<vmem>>, vector<2x8x128xf32>,
    return
  }
  func.func @transform_0(%arg0: i32) -> (i32, i32, i32) {
    %c0_i32 = arith.constant 0 : i32
    %c0_i32_0 = arith.constant 0 : i32
    %c0_i32_1 = arith.constant 0 : i32
    return %arg0, %c0_i32, %c0_i32_0 : i32, i32, i32
  }
  func.func @transform_1(%arg0: i32) -> (i32, i32, i32) {
    %c0_i32 = arith.constant 0 : i32
    %c0_i32_0 = arith.constant 0 : i32
    %c0_i32_1 = arith.constant 0 : i32
    return %arg0, %c0_i32, %c0_i32_0 : i32, i32, i32
  }
  func.func @transform_2(%arg0: i32) -> (i32, i32, i32) {
    %c0_i32 = arith.constant 0 : i32
    %c0_i32_0 = arith.constant 0 : i32
    %c0_i32_1 = arith.constant 0 : i32
    %c0_i32_2 = arith.constant 0 : i32
    return %c0_i32, %c0_i32_0, %c0_i32_1 : i32, i32, i32
  }
  func.func @transform_3(%arg0: i32) -> (i32, i32, i32) {
    %c0_i32 = arith.constant 0 : i32
    %c0_i32_0 = arith.constant 0 : i32
    %c0_i32_1 = arith.constant 0 : i32
    return %arg0, %c0_i32, %c0_i32_0 : i32, i32, i32
  }
}

</mosaic_0001>

<bundles_post_ra>
// kernel: noise_injection.1
= control target key start
LH: loop header
LB: loop body
LE: loop exit
PB: predicated region body
PF: predicated region fallthrough
CT: control target
= control target key end

     0   :  { %s70_s0 = inlined_call_operand.vmem [shape: f32[2,8,128], index: 0, kind: input, shape index: {}]   ;;  %s71_s1 = inlined_call_operand.vmem [shape: f32[2,8,128], index: 1, kind: input, shape index: {}]   ;;  %s72_s2 = inlined_call_operand.vmem [shape: f32[1,8,128], index: 2, kind: input, shape index: {}]   ;;  %s73_s3 = inlined_call_operand.vmem [shape: f32[2,8,128], index: 3, kind: output, shape index: {}]  }
   0x1   :  { %v14_v0 = vld [vmem:[%s70_s0] sm:$0xff]  ;;  %v15_v4 = vld [vmem:[%s70_s0 + $0x8] sm:$0xff] }
   0x2   :  { %v16_v1 = vld [vmem:[%s72_s2] sm:$0xff]  ;;  %v18_v5 = vld [vmem:[%s71_s1 + $0x8] sm:$0xff] }
   0x3   :  { %v17_v2 = vld [vmem:[%s71_s1] sm:$0xff]  ;;  %v20_v6 = vmul.f32 %v18_v5, %v16_v1 }
   0x4   :  { %v19_v3 = vmul.f32 %v17_v2, %v16_v1 }
   0x5   :  { %v22_v8 = vadd.f32 %v20_v6, %v15_v4 }
   0x6   :  { %v21_v7 = vadd.f32 %v19_v3, %v14_v0 }
   0x7   :  { %24 = vst [vmem:[%s73_s3 + $0x8] sm:$0xff] %v22_v8 }
   0x8   :  { %23 = vst [vmem:[%s73_s3] sm:$0xff] %v21_v7 }

</bundles_post_ra>
